<compile_context>
chip_gen: v6e
topology: v6e:2x2x1
jax: 0.10.0
libtpu: 0.0.40
codegen_flags: <defaults>
</compile_context>

<pallas_src>
import functools

import jax
import jax.numpy as jnp
from jax.experimental import pallas as pl
from jax.experimental.pallas import tpu as pltpu


def _round_up(x, m):
    return ((x + m - 1) // m) * m


def _vmem_limit_bytes():
    """~3/4 of physical VMEM: ~96 MiB on v5e/v6e (128 MiB), ~48 MiB on v7x (64 MiB)."""
    cap = 64 * 1024 * 1024
    try:
        info = pltpu.get_tpu_info()
        cap = int(getattr(info, "vmem_capacity_bytes"))
    except Exception:
        pass
    if not cap or cap <= 0:
        cap = 64 * 1024 * 1024
    limit = (3 * cap) // 4
    return min(max(limit, 32 * 1024 * 1024), 112 * 1024 * 1024)


def _spec(block_shape, index_map, *, buffers=None):
    """BlockSpec with optional deeper pipelining (falls back if unsupported)."""
    if buffers is not None and buffers > 2:
        try:
            return pl.BlockSpec(block_shape, index_map,
                                pipeline_mode=pl.Buffered(buffers))
        except Exception:
            pass
    return pl.BlockSpec(block_shape, index_map)


# ---------------------------------------------------------------------------
# Linear:  y = x @ w + b   (full-K weight resident; optional column tiling)
# ---------------------------------------------------------------------------
def _linear_kernel(x_ref, w_ref, b_ref, o_ref):
    acc = jnp.dot(x_ref[...], w_ref[...], preferred_element_type=jnp.float32)
    o_ref[...] = (acc + b_ref[...].astype(jnp.float32)).astype(o_ref.dtype)


def linear(x2, w, b, *, tm=512, tn=None, vmem_limit=None):
    """x2: (N, K); w: (K, M); b: (M,)  ->  (N, M).

    No K grid axis / accumulator: the (K, tn) weight block is resident in VMEM
    and only changes with the (outer) column-tile index, so it is fetched once
    per column tile rather than once per row tile.
    """
    n, kdim = x2.shape
    mout = w.shape[1]
    if vmem_limit is None:
        vmem_limit = _vmem_limit_bytes()
    itemsize = jnp.dtype(x2.dtype).itemsize

    tm = min(tm, _round_up(n, 8))
    if tn is None:
        wbytes = kdim * mout * itemsize
        # Tile the output dim only when a full-width weight block would be large
        # (keeps v7x's 64 MiB VMEM safe and gives the 2nd TC work on wide E).
        if mout % 128 == 0 and mout > 512 and wbytes > vmem_limit // 8:
            tn = 512
        else:
            tn = mout
    tn = min(tn, mout)

    # Column axis OUTER, row axis INNER -> weight block resident across rows.
    grid = (pl.cdiv(mout, tn), pl.cdiv(n, tm))

    b2 = b.reshape(1, mout)
    cost = pl.CostEstimate(
        flops=int(2 * n * kdim * mout),
        transcendentals=0,
        bytes_accessed=int((n * kdim * grid[0] + kdim * mout + mout
                            + n * mout) * itemsize),
    )

    return pl.pallas_call(
        _linear_kernel,
        out_shape=jax.ShapeDtypeStruct((n, mout), x2.dtype),
        grid_spec=pltpu.PrefetchScalarGridSpec(
            num_scalar_prefetch=0,
            grid=grid,
            in_specs=[
                pl.BlockSpec((tm, kdim), lambda j, i: (i, 0)),
                pl.BlockSpec((kdim, tn), lambda j, i: (0, j)),
                pl.BlockSpec((1, tn), lambda j, i: (0, j)),
            ],
            out_specs=pl.BlockSpec((tm, tn), lambda j, i: (i, j)),
        ),
        compiler_params=pltpu.CompilerParams(
            dimension_semantics=("parallel", "parallel"),
            vmem_limit_bytes=vmem_limit,
        ),
        cost_estimate=cost,
    )(x2, w, b2)


# ---------------------------------------------------------------------------
# Attention core: softmax(q*scaling @ k^T + bias) @ v, all heads of one graph
# per grid step.
# ---------------------------------------------------------------------------
def _attn_kernel(q_ref, k_ref, v_ref, *rest, scaling, approx_recip, has_bias):
    if has_bias:
        b_ref, o_ref = rest
    else:
        (o_ref,) = rest

    # Scale q (tq*d elements) instead of the scores (tq*nk elements).
    q = q_ref[...] * scaling
    s = jnp.einsum("hqd,hkd->hqk", q, k_ref[...],
                   preferred_element_type=jnp.float32)
    if has_bias:
        s = s + b_ref[...].astype(jnp.float32)      # broadcasts if bias has hb==1
    m = jnp.max(s, axis=-1, keepdims=True)
    p = jnp.exp(s - m)
    l = jnp.sum(p, axis=-1, keepdims=True)
    # Deferred normalization: divide only tq*d outputs, not tq*nk probs.
    o = jnp.einsum("hqk,hkd->hqd", p.astype(v_ref.dtype), v_ref[...],
                   preferred_element_type=jnp.float32)
    inv = pl.reciprocal(l, approx=approx_recip)
    o_ref[...] = (o * inv).astype(o_ref.dtype)
    # TODO(synk): attention-prob dropout (training path) would use pltpu.prng_*;
    # the inference forward (p=0) is the identity and is what is implemented.


def attention_core(q, k, v, bias, scaling, *, tq=128, approx_recip=False,
                   vmem_limit=None, kv_buffers=3):
    """q,k,v: (G, H, n, d); bias: None or (G|1, H|1, n, n) -> (G, H, n, d)."""
    g, h, n, d = q.shape
    nk = k.shape[2]
    if vmem_limit is None:
        vmem_limit = _vmem_limit_bytes()
    itemsize = jnp.dtype(q.dtype).itemsize
    bias_itemsize = jnp.dtype(bias.dtype).itemsize if bias is not None else 0

    tq = min(tq, _round_up(n, 8))

    def step_bytes(t):
        kv = 2 * kv_buffers * h * nk * d * itemsize          # K + V buffers
        qo = 2 * 2 * h * t * d * itemsize                    # q + out (double buf)
        bias_b = 2 * h * t * nk * bias_itemsize
        scores = 2 * h * t * nk * 4                          # f32 s / p tiles
        return kv + qo + bias_b + scores

    while tq > 8 and step_bytes(tq) > vmem_limit:
        tq = _round_up(tq // 2, 8)
    if step_bytes(tq) > vmem_limit:
        # TODO(synk): key-tiled flash-style fallback for very large n_node.
        raise NotImplementedError(
            "n_node too large for the full-key attention kernel")

    grid = (g, pl.cdiv(n, tq))

    def q_map(gi, i):
        return (gi, 0, i, 0)

    def kv_map(gi, i):
        return (gi, 0, 0, 0)

    in_specs = [
        pl.BlockSpec((None, h, tq, d), q_map),
        _spec((None, h, nk, d), kv_map, buffers=kv_buffers),
        _spec((None, h, nk, d), kv_map, buffers=kv_buffers),
    ]
    args = [q, k, v]
    if bias is not None:
        gb, hb = bias.shape[0], bias.shape[1]
        if gb == 1:
            bias_map = lambda gi, i: (0, 0, i, 0)     # shared across graphs
        else:
            bias_map = lambda gi, i: (gi, 0, i, 0)
        in_specs.append(pl.BlockSpec((None, hb, tq, nk), bias_map))
        args.append(bias)

    cost = pl.CostEstimate(
        flops=int(4 * g * h * n * nk * d + 4 * g * h * n * nk),
        transcendentals=int(g * h * n * nk),
        bytes_accessed=int(4 * g * h * n * d * itemsize
                           + (g * h * n * nk * bias_itemsize
                              if bias is not None else 0)),
    )

    kern = functools.partial(_attn_kernel, scaling=scaling,
                             approx_recip=approx_recip,
                             has_bias=bias is not None)
    return pl.pallas_call(
        kern,
        out_shape=jax.ShapeDtypeStruct((g, h, n, d), q.dtype),
        grid_spec=pltpu.PrefetchScalarGridSpec(
            num_scalar_prefetch=0,
            grid=grid,
            in_specs=in_specs,
            out_specs=pl.BlockSpec((None, h, tq, d), q_map),
        ),
        compiler_params=pltpu.CompilerParams(
            dimension_semantics=("parallel", "parallel"),
            vmem_limit_bytes=vmem_limit,
        ),
        cost_estimate=cost,
    )(*args)


# ---------------------------------------------------------------------------
# Full module wrapper
# ---------------------------------------------------------------------------
def _normalize_bias(attn_bias, n_graph, num_heads, n_node, dtype):
    """Return bias as (G|1, H|1, n, n) in `dtype`, or None (no materialized broadcast)."""
    if attn_bias is None:
        return None
    ab = jnp.asarray(attn_bias, dtype)
    if ab.ndim == 2:
        return ab.reshape(1, 1, n_node, n_node)
    if ab.ndim == 3:
        if ab.shape[0] == n_graph * num_heads:
            return ab.reshape(n_graph, num_heads, n_node, n_node)
        if ab.shape[0] == 1:
            return ab.reshape(1, 1, n_node, n_node)
        raise ValueError(f"unsupported attn_bias batch dim {ab.shape[0]}")
    if ab.ndim == 4:
        assert ab.shape[0] in (1, n_graph) and ab.shape[1] in (1, num_heads)
        return ab
    raise ValueError(f"unsupported attn_bias rank {ab.ndim}")


def self_multihead_attention(query, attn_bias, w_in, b_in, w_out, b_out, *,
                             num_heads, scaling_factor=1, compute_dtype=None):
    """query: (n_node, n_graph, E); attn_bias: None / (n,n) / (1,n,n) /
    (G*H,n,n) / (G|1,H|1,n,n).  Weights pre-transposed: w_in (E, 3E), w_out (E, E).
    compute_dtype=jnp.bfloat16 streams activations/bias in bf16 (f32 MXU accumulation)."""
    n_node, n_graph, embed_dim = query.shape
    head_dim = embed_dim // num_heads
    assert head_dim * num_heads == embed_dim, "embed_dim must be divisible by num_heads"
    scaling = float((head_dim * scaling_factor) ** (-0.5))

    out_dtype = query.dtype
    cd = jnp.dtype(compute_dtype) if compute_dtype is not None else jnp.dtype(query.dtype)
    approx_recip = cd != jnp.dtype(jnp.float32)
    vlim = _vmem_limit_bytes()

    # ---- in_proj ----
    x2 = query.reshape(n_node * n_graph, embed_dim).astype(cd)
    qkv = linear(x2, w_in.astype(cd), b_in.astype(cd), vmem_limit=vlim)   # (n*G, 3E)

    # (n, G, 3E) -> (3, G, H, n, d): one free reshape + one transpose; leading-axis
    # slices replace jnp.split + three per-tensor transposes.
    qkv = qkv.reshape(n_node, n_graph, 3, num_heads, head_dim)
    qkv = jnp.transpose(qkv, (2, 1, 3, 0, 4))
    q, k, v = qkv[0], qkv[1], qkv[2]

    bias4 = _normalize_bias(attn_bias, n_graph, num_heads, n_node, cd)

    # ---- attention ----
    attn = attention_core(q, k, v, bias4, scaling,
                          approx_recip=approx_recip, vmem_limit=vlim)      # (G,H,n,d)

    # ---- out_proj ----
    attn = jnp.transpose(attn, (2, 0, 1, 3)).reshape(n_node * n_graph, embed_dim)
    out = linear(attn, w_out.astype(cd), b_out.astype(cd), vmem_limit=vlim)
    return out.reshape(n_node, n_graph, embed_dim).astype(out_dtype)


# ---------------------------------------------------------------------------
# Pure-JAX reference (mirrors the PyTorch forward)
# ---------------------------------------------------------------------------
def _reference(query, attn_bias, w_in, b_in, w_out, b_out, *, num_heads,
               scaling_factor=1):
    n_node, n_graph, e = query.shape
    head_dim = e // num_heads
    scaling = (head_dim * scaling_factor) ** (-0.5)
    qkv = query @ w_in + b_in
    q, k, v = jnp.split(qkv, 3, axis=-1)

    def reshp(t):
        return jnp.transpose(t.reshape(n_node, n_graph * num_heads, head_dim),
                             (1, 0, 2))

    q = reshp(q) * scaling
    k = reshp(k)
    v = reshp(v)
    s = jnp.einsum("bqd,bkd->bqk", q, k)
    if attn_bias is not None:
        s = s + attn_bias
    p = jax.nn.softmax(s, axis=-1)
    o = jnp.einsum("bqk,bkd->bqd", p, v)
    o = jnp.transpose(o, (1, 0, 2)).reshape(n_node, n_graph, e)
    return o @ w_out + b_out


if __name__ == "__main__":
    n_node, n_graph, embed_dim, num_heads = 8, 2, 32, 4

    key = jax.random.PRNGKey(0)
    kq, kb, kw1, kb1, kw2, kb2 = jax.random.split(key, 6)

    query = jax.random.normal(kq, (n_node, n_graph, embed_dim), jnp.float32)
    attn_bias = 0.1 * jax.random.normal(
        kb, (n_graph * num_heads, n_node, n_node), jnp.float32)

    # nn.Linear-style init (uniform +-1/sqrt(fan_in)), weights pre-transposed.
    lim = 1.0 / (embed_dim ** 0.5)
    w_in = jax.random.uniform(kw1, (embed_dim, 3 * embed_dim), jnp.float32, -lim, lim)
    b_in = jax.random.uniform(kb1, (3 * embed_dim,), jnp.float32, -lim, lim)
    w_out = jax.random.uniform(kw2, (embed_dim, embed_dim), jnp.float32, -lim, lim)
    b_out = jax.random.uniform(kb2, (embed_dim,), jnp.float32, -lim, lim)

    ref = _reference(query, attn_bias, w_in, b_in, w_out, b_out, num_heads=num_heads)
    ref_nb = _reference(query, None, w_in, b_in, w_out, b_out, num_heads=num_heads)

    # f32 path (tight check).
    out = jax.block_until_ready(
        self_multihead_attention(query, attn_bias, w_in, b_in, w_out, b_out,
                                 num_heads=num_heads))
    assert out.shape == (n_node, n_graph, embed_dim)
    err = float(jnp.max(jnp.abs(out - ref)))
    assert err < 5e-4, f"f32 mismatch: {err}"

    # bias-free kernel path (no zeros materialization).
    out_nb = jax.block_until_ready(
        self_multihead_attention(query, None, w_in, b_in, w_out, b_out,
                                 num_heads=num_heads))
    err_nb = float(jnp.max(jnp.abs(out_nb - ref_nb)))
    assert err_nb < 5e-4, f"no-bias mismatch: {err_nb}"

    # bf16 compute path (MXU-friendly; loose check).
    out_bf = jax.block_until_ready(
        self_multihead_attention(query, attn_bias, w_in, b_in, w_out, b_out,
                                 num_heads=num_heads, compute_dtype=jnp.bfloat16))
    err_bf = float(jnp.max(jnp.abs(out_bf.astype(jnp.float32) - ref)))
    assert err_bf < 1e-1, f"bf16 mismatch: {err_bf}"

    print("KERNEL_OK")
</pallas_src>

<mosaic_0001>
module attributes {stable_mosaic.version = 11 : i64} {
  func.func @_linear_kernel(%arg0: i32, %arg1: i32, %arg2: memref<16x32xf32, #tpu.memory_space<vmem>>, %arg3: memref<32x96xf32, #tpu.memory_space<vmem>>, %arg4: memref<1x96xf32, #tpu.memory_space<vmem>>, %arg5: memref<16x96xf32, #tpu.memory_space<vmem>>) attributes {dimension_semantics = [#tpu.dimension_semantics<parallel>, #tpu.dimension_semantics<parallel>], iteration_bounds = array<i64: 1, 1>, scalar_prefetch = 0 : i64, scratch_operands = 0 : i64, tpu.core_type = #tpu.core_type<tc>, window_params = [{transform_indices = @transform_0, window_bounds = array<i64: 16, 32>}, {transform_indices = @transform_1, window_bounds = array<i64: 32, 96>}, {transform_indices = @transform_2, window_bounds = array<i64: 1, 96>}, {transform_indices = @transform_3, window_bounds = array<i64: 16, 96>}]} {
    %c0 = arith.constant 0 : index
    %c0_0 = arith.constant 0 : index
    %0 = vector.load %arg2[%c0, %c0_0] : memref<16x32xf32, #tpu.memory_space<vmem>>, vector<16x32xf32>
    %c0_1 = arith.constant 0 : index
    %c0_2 = arith.constant 0 : index
    %1 = vector.load %arg3[%c0_1, %c0_2] : memref<32x96xf32, #tpu.memory_space<vmem>>, vector<32x96xf32>
    %cst = arith.constant dense<0.000000e+00> : vector<16x96xf32>
    %2 = tpu.matmul %0, %1, %cst {dimension_numbers = #tpu.dot_dimension_numbers<[1], [0], [0], [1], [0, 0, 1, 1], [], []>} : vector<16x32xf32>, vector<32x96xf32>, vector<16x96xf32> -> vector<16x96xf32>
    %c0_3 = arith.constant 0 : index
    %c0_4 = arith.constant 0 : index
    %3 = vector.load %arg4[%c0_3, %c0_4] : memref<1x96xf32, #tpu.memory_space<vmem>>, vector<1x96xf32>
    %4 = vector.broadcast %3 : vector<1x96xf32> to vector<16x96xf32>
    %5 = arith.addf %2, %4 : vector<16x96xf32>
    %c0_5 = arith.constant 0 : index
    %c0_6 = arith.constant 0 : index
    %6 = vector.load %arg5[%c0_5, %c0_6] : memref<16x96xf32, #tpu.memory_space<vmem>>, vector<16x96xf32>
    tpu.vector_store %arg5[%c0_5, %c0_6], %5 {strides = array<i32>} : memref<16x96xf32, #tpu.memory_space<vmem>>, vector<16x96xf32>,
    return
  }
  func.func @transform_0(%arg0: i32, %arg1: i32) -> (i32, i32) {
    %c0_i32 = arith.constant 0 : i32
    %c0_i32_0 = arith.constant 0 : i32
    return %arg1, %c0_i32 : i32, i32
  }
  func.func @transform_1(%arg0: i32, %arg1: i32) -> (i32, i32) {
    %c0_i32 = arith.constant 0 : i32
    %c0_i32_0 = arith.constant 0 : i32
    return %c0_i32, %arg0 : i32, i32
  }
  func.func @transform_2(%arg0: i32, %arg1: i32) -> (i32, i32) {
    %c0_i32 = arith.constant 0 : i32
    %c0_i32_0 = arith.constant 0 : i32
    return %c0_i32, %arg0 : i32, i32
  }
  func.func @transform_3(%arg0: i32, %arg1: i32) -> (i32, i32) {
    %c0_i32 = arith.constant 0 : i32
    return %arg1, %arg0 : i32, i32
  }
}

</mosaic_0001>

<bundles_post_ra>
// kernel: tpu_custom_call.1
= control target key start
LH: loop header
LB: loop body
LE: loop exit
PB: predicated region body
PF: predicated region fallthrough
CT: control target
= control target key end

     0   :  { %8 = vsyncpa [#allocation3], 0  ;;  %s298_s0 = inlined_call_operand.hbm [shape: f32[16,32], index: 0, kind: input, shape index: {}]   ;;  %s299_s1 = inlined_call_operand.hbm [shape: f32[32,96], index: 1, kind: input, shape index: {}]   ;;  %s300_s2 = inlined_call_operand.vmem [shape: f32[1,96], index: 2, kind: input, shape index: {}]   ;;  %s301_s3 = inlined_call_operand.hbm [shape: f32[16,96], index: 3, kind: output, shape index: {}]  }
   0x1   :  { %9 = vsyncpa [#allocation6], 0 }
   0x2   :  { %10 = vsyncpa [#allocation4], 0  ;;  %s250_s12 = smov [#allocation2]  }
   0x3   :  { %s16_s13 = sshll.u32 %s250_s12, 4  ;;  %s17_s13 = int_to_ptr.vmem [resolvable:$true] %s16_s13 }
   0x4   :  { %s192_s14 = scalar_lea.vmem %s17_s13, 256  ;;  %p197_p1 = scmp.lt.s32.totalorder %s17_s13, %s17_s13 }
   0x5   :  { %p193_p0 = scmp.ne.s32.totalorder %s17_s13, %s192_s14  ;;  %p198_p2 = scmp.lt.s32.totalorder %s192_s14, %s192_s14 }
   0x7   :  { %p199_p3 = por %p198_p2, %p197_p1 }
   0x9   :  { %p200_p4 = pnand %p199_p3, %p193_p0 }
   0xb   :  { %203 = shalt.err (!%p200_p4)
}
   0xc   :  { %s251_s15 = smov 128   ;;  %s252_s16 = smov 8  }
   0xd   :  { %22 = dma.hbm_to_vmem [thread:$0]  %s298_s0, 256, %s17_s13, [#allocation3], %s251_s15, %s251_s15, %s252_s16  }
   0xe   :  { %s253_s19 = smov [#allocation5]  }
   0xf   :  { %s28_s20 = sshll.u32 %s253_s19, 4  ;;  %s29_s20 = int_to_ptr.vmem [resolvable:$true] %s28_s20 }
  0x10   :  { %s212_s21 = scalar_lea.vmem %s29_s20, 512  ;;  %p217_p6 = scmp.lt.s32.totalorder %s29_s20, %s29_s20 }
  0x11   :  { %p213_p5 = scmp.ne.s32.totalorder %s29_s20, %s212_s21  ;;  %p218_p7 = scmp.lt.s32.totalorder %s212_s21, %s212_s21 }
  0x13   :  { %p219_p8 = por %p218_p7, %p217_p6 }
  0x15   :  { %p220_p9 = pnand %p219_p8, %p213_p5 }
  0x17   :  { %223 = shalt.err (!%p220_p9)
}
  0x18   :  { %34 = dma.hbm_to_vmem [thread:$0]  %s299_s1, 512, %s29_s20, [#allocation6], %s251_s15, %s251_s15, %s252_s16  }
  0x19   :  { %244 = dma.done.wait [#allocation3], 256  }
  0x1a   :  { %245 = vsyncadd [#allocation3], 4294967040 }
  0x1b   :  { %246 = dma.done.wait [#allocation6], 512  }
  0x1c   :  { %247 = vsyncadd [#allocation6], 4294966784  ;;  %vm56_vm0 = vcmask 261120   ;;  %v48_v0 = vld [vmem:[#allocation5 + $0x18] sm:$0xff]  ;;  %v47_v1 = vld [vmem:[#allocation5 + $0x10] sm:$0xff]  ;;  %vm138_vm1 = vcmask 785408  }
  0x1d   :  { %168 = vmatprep.subr.mxu0 %v48_v0  ;;  %v43_v2 = vld [vmem:[#allocation2] sm:$0xff]  ;;  %v46_v3 = vld [vmem:[#allocation5 + $0x8] sm:$0xff]  ;;  %v45_v4 = vld [vmem:[#allocation5] sm:$0xff]  ;;  %s254_s24 = smov [#allocation7]  }
  0x1e   :  { %169 = vmatpush3.msra.mxu0 %v48_v0  ;;  %176 = vmatprep.mubr.msk.f32.mxu0 %vm56_vm0, %v43_v2  ;;  %v44_v5 = vld [vmem:[#allocation2 + $0x8] sm:$0xff]  ;;  %v159_v6 = vld [vmem:[%s300_s2] ss:$0 sm:$0xff]  ;;  %s146_s25 = sshll.u32 %s254_s24, 4  ;;  %s147_s25 = int_to_ptr.vmem [resolvable:$true] %s146_s25 }
  0x1f   :  { %170 = vmatprep.subr.mxu0 %v47_v1  ;;  %s224_s26 = scalar_lea.vmem %s147_s25, 256  ;;  %p229_p11 = scmp.lt.s32.totalorder %s147_s25, %s147_s25 }
  0x20   :  { %171 = vmatpush3.msra.mxu0 %v47_v1  ;;  %p225_p10 = scmp.ne.s32.totalorder %s147_s25, %s224_s26  ;;  %p230_p12 = scmp.lt.s32.totalorder %s224_s26, %s224_s26 }
  0x21   :  { %172 = vmatprep.subr.mxu0 %v46_v3 }
  0x22   :  { %173 = vmatpush3.msra.mxu0 %v46_v3  ;;  %p231_p13 = por %p230_p12, %p229_p11 }
  0x23   :  { %174 = vmatprep.subr.mxu0 %v45_v4 }
  0x24   :  { %175 = vmatpush3.msra.mxu0 %v45_v4  ;;  %p232_p0 = pnand %p231_p13, %p225_p10 }
  0x25   :  { %177 = vmatmul.mubr.msk.f32.vlgmr.msra.gmra.mxu0 %vm56_vm0, %v44_v5 }
  0xe5   :  { %v178_v7 = vpop.f32.mrf.mxu0 }
  0xe6   :  { %v135_v8 = vadd.f32 %v178_v7, %v159_v6 }
  0xe7   :  { %v129_v9 = vpop.f32.mrf.mxu0 }
  0xe8   :  { %v130_v10 = vadd.f32 %v159_v6, %v129_v9  ;;  %140 = vst.msk [vmem:[#allocation7 + $0x8] sm:$0xff] %vm138_vm1, %v135_v8 }
  0xea   :  { %139 = vst.msk [vmem:[#allocation7] sm:$0xff] %vm138_vm1, %v130_v10 }
  0xeb   :  { %235 = shalt.err (!%p232_p0)
}
  0xec   :  { %152 = dma.vmem_to_hbm [thread:$0]  %s147_s25, 256, %s301_s3, [#allocation4], %s251_s15, %s251_s15, %s252_s16  }
  0xed   :  { %248 = dma.done.wait [#allocation4], 256  }
  0xee   :  { %249 = vsyncadd [#allocation4], 4294967040 }
  0xef   :  { %156 = vsyncpa [#allocation3], 1 }
  0xf0   :  { %157 = vsyncpa [#allocation6], 1 }
  0xf1   :  { %158 = vsyncpa [#allocation4], 1 }

</bundles_post_ra>
